<compile_context>
chip_gen: v5e
topology: v5e:2x2
jax: 0.10.0
libtpu: 0.0.40
codegen_flags: <defaults>
</compile_context>

<pallas_src>
import functools

import numpy as np
import jax
import jax.numpy as jnp
from jax.experimental import pallas as pl
from jax.experimental.pallas import tpu as pltpu

_LANES = 128


def _focal_kernel(pred_ref, lab_ref, out_ref, *, rows, gamma, smooth, alpha,
                  need_row_mask):
    t = pl.program_id(1)
    c, s_tile, lanes = pred_ref.shape

    x = pred_ref[...].astype(jnp.float32)        # (C, S, 128) logits, cast in-kernel
    labels = lab_ref[...]                        # (S, 128) int32

    if need_row_mask:
        # only the last pixel tile is ragged; this branch is compiled in only
        # when rows % s_tile != 0 (static Python check)
        row = t * s_tile + jax.lax.broadcasted_iota(jnp.int32, (s_tile, lanes), 0)
        valid = row < rows                       # (S, 128) bool
        # sanitize padded logits so exp() cannot produce inf/NaN
        x = jnp.where(valid[None], x, 0.0)

    # numerically-stable softmax over the class axis (leading, C vregs deep)
    m = jnp.max(x, axis=0)                       # (S, 128)
    ex = jnp.exp(x - m[None])                    # (C, S, 128)  -- EUP
    denom = jnp.sum(ex, axis=0)                  # (S, 128)

    # gather label-class prob and alpha with a small unrolled per-class select
    ex_label = jnp.zeros((s_tile, lanes), jnp.float32)
    alpha_px = jnp.zeros((s_tile, lanes), jnp.float32)
    for ci in range(c):
        match = labels == ci
        ex_label = jnp.where(match, ex[ci], ex_label)
        alpha_px = jnp.where(match, jnp.float32(alpha[ci]), alpha_px)

    pt = ex_label * pl.reciprocal(denom, approx=True) + smooth   # (S, 128)
    one_minus = 1.0 - pt
    if float(gamma).is_integer() and gamma >= 0:
        # unrolled multiplies (exact, matches torch.pow for integral gamma)
        pow_term = jnp.ones_like(pt)
        for _ in range(int(gamma)):
            pow_term = pow_term * one_minus
    else:
        # clamp: pt can slightly exceed 1 (smooth + approx recip) -> NaN guard
        pow_term = jnp.power(jnp.maximum(one_minus, 0.0), jnp.float32(gamma))

    loss_px = -alpha_px * pow_term * jnp.log(pt)                 # (S, 128)
    if need_row_mask:
        loss_px = jnp.where(valid, loss_px, 0.0)

    # per-lane partial (sublane reduce only); tiny output writeback per block
    out_ref[...] = jnp.sum(loss_px, axis=0, keepdims=True)       # (1, 128)


def _choose_s_tile(rows, itemsize, target_block_pixels=64 * 1024, min_tiles=4):
    """Sublane-tile (rows per block). Multiple of 8 (16 for sub-32-bit dtypes)
    or the full extent.  Bounded by a ~target_block_pixels block size and by a
    minimum tile count per image (pipeline overlap / v7x dual-TC)."""
    sub = 8 if itemsize >= 4 else 16
    if rows <= sub:
        return rows                                  # full extent, always legal
    s_bytes = max(sub, (target_block_pixels // _LANES // sub) * sub)
    s_split = -(-rows // min_tiles)                  # ceil(rows / min_tiles)
    s_split = max(sub, -(-s_split // sub) * sub)     # round up to sublane mult
    s_tile = min(s_bytes, s_split)
    if s_tile >= rows:
        return rows
    return s_tile


def _default_vmem_limit_bytes():
    try:
        cap = int(getattr(pltpu.get_tpu_info(), "vmem_capacity_bytes"))
    except Exception:
        cap = 128 * 1024 * 1024
    # half of physical VMEM, capped at 48 MiB (blocks here are ~1-2 MiB)
    return min(cap // 2, 48 * 1024 * 1024)


def focal_loss(pred, labels, *, num_class, alpha=None, gamma=2.0, smooth=1e-4,
               target_block_pixels=64 * 1024, min_tiles=4, vmem_limit_bytes=None):
    """pred: (N, C, H, W) float (any float dtype; bf16 halves HBM traffic),
    labels: (N, H, W) int.  Returns scalar focal loss (mean over all pixels)."""
    n, c, h, w = pred.shape
    assert c == num_class
    hw = h * w
    p_total = n * hw

    # per-class alpha as static Python floats (same semantics as torch __init__)
    if alpha is None:
        alpha_t = tuple([1.0] * c)
    else:
        a = np.asarray(alpha, dtype=np.float32)
        alpha_t = (tuple([float(a)] * c) if a.ndim == 0
                   else tuple(float(v) for v in a.reshape(-1)))
    if len(alpha_t) != c:
        raise RuntimeError('the length not equal to number of class')

    rows = (hw + _LANES - 1) // _LANES
    hw_pad = rows * _LANES

    pred3 = pred.reshape(n, c, hw)                       # free reshape, native dtype
    lab2 = labels.reshape(n, hw).astype(jnp.int32)
    if hw_pad != hw:
        # one-time pad so pixels reshape onto (rows, 128); padded pixels get
        # sentinel label -1 -> exactly zero loss contribution in-kernel
        pred3 = jnp.pad(pred3, ((0, 0), (0, 0), (0, hw_pad - hw)))
        lab2 = jnp.pad(lab2, ((0, 0), (0, hw_pad - hw)), constant_values=-1)

    pred4 = pred3.reshape(n, c, rows, _LANES)            # pixels dense on (sub, lane)
    lab3 = lab2.reshape(n, rows, _LANES)

    itemsize = jnp.dtype(pred.dtype).itemsize
    s_tile = _choose_s_tile(rows, itemsize, target_block_pixels, min_tiles)
    num_tiles = (rows + s_tile - 1) // s_tile
    need_row_mask = (rows % s_tile) != 0                 # static; interior tiles free

    if vmem_limit_bytes is None:
        vmem_limit_bytes = _default_vmem_limit_bytes()

    partials = pl.pallas_call(
        functools.partial(_focal_kernel, rows=rows, gamma=float(gamma),
                          smooth=float(smooth), alpha=alpha_t,
                          need_row_mask=need_row_mask),
        out_shape=jax.ShapeDtypeStruct((n, num_tiles, 1, _LANES), jnp.float32),
        grid_spec=pltpu.PrefetchScalarGridSpec(
            num_scalar_prefetch=0,
            grid=(n, num_tiles),
            in_specs=[
                pl.BlockSpec((None, c, s_tile, _LANES),
                             lambda i, t: (i, 0, t, 0)),          # pred  (C, S, 128)
                pl.BlockSpec((None, s_tile, _LANES),
                             lambda i, t: (i, t, 0)),             # labels (S, 128)
            ],
            out_specs=pl.BlockSpec((None, None, 1, _LANES),
                                   lambda i, t: (i, t, 0, 0)),    # (1, 128) partial
        ),
        compiler_params=pltpu.CompilerParams(
            dimension_semantics=("parallel", "parallel"),
            vmem_limit_bytes=int(vmem_limit_bytes),
        ),
    )(pred4, lab3)

    return jnp.sum(partials) / p_total


def _reference(pred, labels, alpha_vec, gamma, smooth=1e-4):
    # pure-JAX reference matching the torch module's forward
    b, c, h, w = pred.shape
    p = jax.nn.softmax(pred.astype(jnp.float32), axis=1)
    p = jnp.transpose(p, (0, 2, 3, 1)).reshape(-1, c)
    lab = labels.reshape(-1)
    pt = jnp.take_along_axis(p, lab[:, None], axis=1)[:, 0] + smooth
    logpt = jnp.log(pt)
    a = alpha_vec[lab]
    class_weight = -a * jnp.power(1.0 - pt, gamma)
    return jnp.mean(class_weight * logpt)


if __name__ == "__main__":
    num_class = 4
    focal_alpha = 0.25
    focal_gamma = 2.0

    key = jax.random.PRNGKey(0)
    k1, k2 = jax.random.split(key)
    N, C, H, W = 2, num_class, 16, 16
    pred = jax.random.normal(k1, (N, C, H, W), dtype=jnp.float32)
    labels = jax.random.randint(k2, (N, H, W), 0, C, dtype=jnp.int32)

    out = focal_loss(pred, labels, num_class=num_class,
                     alpha=focal_alpha, gamma=focal_gamma)
    out = jax.block_until_ready(out)

    alpha_vec = jnp.full((C,), focal_alpha, jnp.float32)
    ref = _reference(pred, labels, alpha_vec, focal_gamma)

    assert abs(float(out) - float(ref)) < 2e-3, (float(out), float(ref))
    print("KERNEL_OK")
</pallas_src>

<mosaic_0001>
module attributes {stable_mosaic.version = 11 : i64} {
  func.func @_focal_kernel(%arg0: i32, %arg1: i32, %arg2: memref<1x4x2x128xf32, #tpu.memory_space<vmem>>, %arg3: memref<1x2x128xi32, #tpu.memory_space<vmem>>, %arg4: memref<1x1x1x128xf32, #tpu.memory_space<vmem>>) attributes {dimension_semantics = [#tpu.dimension_semantics<parallel>, #tpu.dimension_semantics<parallel>], iteration_bounds = array<i64: 2, 1>, scalar_prefetch = 0 : i64, scratch_operands = 0 : i64, tpu.core_type = #tpu.core_type<tc>, window_params = [{transform_indices = @transform_0, window_bounds = array<i64: 1, 4, 2, 128>}, {transform_indices = @transform_1, window_bounds = array<i64: 1, 2, 128>}, {transform_indices = @transform_2, window_bounds = array<i64: 1, 1, 1, 128>}]} {
    %c0 = arith.constant 0 : index
    %c0_0 = arith.constant 0 : index
    %c0_1 = arith.constant 0 : index
    %c0_2 = arith.constant 0 : index
    %0 = vector.load %arg2[%c0, %c0_0, %c0_1, %c0_2] : memref<1x4x2x128xf32, #tpu.memory_space<vmem>>, vector<1x4x2x128xf32>
    %1 = vector.shape_cast %0 : vector<1x4x2x128xf32> to vector<4x2x128xf32>
    %c0_3 = arith.constant 0 : index
    %c0_4 = arith.constant 0 : index
    %c0_5 = arith.constant 0 : index
    %2 = vector.load %arg3[%c0_3, %c0_4, %c0_5] : memref<1x2x128xi32, #tpu.memory_space<vmem>>, vector<1x2x128xi32>
    %3 = vector.shape_cast %2 : vector<1x2x128xi32> to vector<2x128xi32>
    %cst = arith.constant dense<0xFF800000> : vector<2x128xf32>
    %4 = vector.multi_reduction <maximumf>, %1, %cst [0] : vector<4x2x128xf32> to vector<2x128xf32>
    %5 = vector.shape_cast %4 : vector<2x128xf32> to vector<1x2x128xf32>
    %6 = vector.broadcast %5 : vector<1x2x128xf32> to vector<4x2x128xf32>
    %7 = arith.subf %1, %6 : vector<4x2x128xf32>
    %8 = math.exp %7 : vector<4x2x128xf32>
    %cst_6 = arith.constant dense<0.000000e+00> : vector<2x128xf32>
    %9 = vector.multi_reduction <add>, %8, %cst_6 [0] : vector<4x2x128xf32> to vector<2x128xf32>
    %cst_7 = arith.constant 0.000000e+00 : f32
    %10 = vector.broadcast %cst_7 : f32 to vector<2x128xf32>
    %cst_8 = arith.constant 0.000000e+00 : f32
    %11 = vector.broadcast %cst_8 : f32 to vector<2x128xf32>
    %c0_i32 = arith.constant 0 : i32
    %12 = vector.broadcast %c0_i32 : i32 to vector<2x128xi32>
    %13 = arith.cmpi eq, %3, %12 : vector<2x128xi32>
    %14 = vector.extract_strided_slice %8 {offsets = [0, 0, 0], sizes = [1, 2, 128], strides = [1, 1, 1]} : vector<4x2x128xf32> to vector<1x2x128xf32>
    %15 = vector.shape_cast %14 : vector<1x2x128xf32> to vector<2x128xf32>
    %16 = arith.select %13, %15, %10 : vector<2x128xi1>, vector<2x128xf32>
    %cst_9 = arith.constant 2.500000e-01 : f32
    %17 = vector.broadcast %cst_9 : f32 to vector<2x128xf32>
    %18 = arith.select %13, %17, %11 : vector<2x128xi1>, vector<2x128xf32>
    %c1_i32 = arith.constant 1 : i32
    %19 = vector.broadcast %c1_i32 : i32 to vector<2x128xi32>
    %20 = arith.cmpi eq, %3, %19 : vector<2x128xi32>
    %21 = vector.extract_strided_slice %8 {offsets = [1, 0, 0], sizes = [1, 2, 128], strides = [1, 1, 1]} : vector<4x2x128xf32> to vector<1x2x128xf32>
    %22 = vector.shape_cast %21 : vector<1x2x128xf32> to vector<2x128xf32>
    %23 = arith.select %20, %22, %16 : vector<2x128xi1>, vector<2x128xf32>
    %cst_10 = arith.constant 2.500000e-01 : f32
    %24 = vector.broadcast %cst_10 : f32 to vector<2x128xf32>
    %25 = arith.select %20, %24, %18 : vector<2x128xi1>, vector<2x128xf32>
    %c2_i32 = arith.constant 2 : i32
    %26 = vector.broadcast %c2_i32 : i32 to vector<2x128xi32>
    %27 = arith.cmpi eq, %3, %26 : vector<2x128xi32>
    %28 = vector.extract_strided_slice %8 {offsets = [2, 0, 0], sizes = [1, 2, 128], strides = [1, 1, 1]} : vector<4x2x128xf32> to vector<1x2x128xf32>
    %29 = vector.shape_cast %28 : vector<1x2x128xf32> to vector<2x128xf32>
    %30 = arith.select %27, %29, %23 : vector<2x128xi1>, vector<2x128xf32>
    %cst_11 = arith.constant 2.500000e-01 : f32
    %31 = vector.broadcast %cst_11 : f32 to vector<2x128xf32>
    %32 = arith.select %27, %31, %25 : vector<2x128xi1>, vector<2x128xf32>
    %c3_i32 = arith.constant 3 : i32
    %33 = vector.broadcast %c3_i32 : i32 to vector<2x128xi32>
    %34 = arith.cmpi eq, %3, %33 : vector<2x128xi32>
    %35 = vector.extract_strided_slice %8 {offsets = [3, 0, 0], sizes = [1, 2, 128], strides = [1, 1, 1]} : vector<4x2x128xf32> to vector<1x2x128xf32>
    %36 = vector.shape_cast %35 : vector<1x2x128xf32> to vector<2x128xf32>
    %37 = arith.select %34, %36, %30 : vector<2x128xi1>, vector<2x128xf32>
    %cst_12 = arith.constant 2.500000e-01 : f32
    %38 = vector.broadcast %cst_12 : f32 to vector<2x128xf32>
    %39 = arith.select %34, %38, %32 : vector<2x128xi1>, vector<2x128xf32>
    %40 = tpu.reciprocal %9 {approx = true} : vector<2x128xf32> -> vector<2x128xf32>
    %41 = arith.mulf %37, %40 : vector<2x128xf32>
    %cst_13 = arith.constant 9.99999974E-5 : f32
    %42 = vector.broadcast %cst_13 : f32 to vector<2x128xf32>
    %43 = arith.addf %41, %42 : vector<2x128xf32>
    %cst_14 = arith.constant 1.000000e+00 : f32
    %44 = vector.broadcast %cst_14 : f32 to vector<2x128xf32>
    %45 = arith.subf %44, %43 : vector<2x128xf32>
    %cst_15 = arith.constant 1.000000e+00 : f32
    %46 = vector.broadcast %cst_15 : f32 to vector<2x128xf32>
    %47 = arith.mulf %46, %45 : vector<2x128xf32>
    %48 = arith.mulf %47, %45 : vector<2x128xf32>
    %cst_16 = arith.constant 0.000000e+00 : f32
    %49 = vector.broadcast %cst_16 : f32 to vector<2x128xf32>
    %50 = arith.subf %49, %39 : vector<2x128xf32>
    %51 = arith.mulf %50, %48 : vector<2x128xf32>
    %52 = math.log %43 : vector<2x128xf32>
    %53 = arith.mulf %51, %52 : vector<2x128xf32>
    %cst_17 = arith.constant dense<0.000000e+00> : vector<128xf32>
    %54 = vector.multi_reduction <add>, %53, %cst_17 [0] : vector<2x128xf32> to vector<128xf32>
    %55 = vector.shape_cast %54 : vector<128xf32> to vector<1x128xf32>
    %c0_18 = arith.constant 0 : index
    %c0_19 = arith.constant 0 : index
    %c0_20 = arith.constant 0 : index
    %c0_21 = arith.constant 0 : index
    %56 = vector.load %arg4[%c0_18, %c0_19, %c0_20, %c0_21] : memref<1x1x1x128xf32, #tpu.memory_space<vmem>>, vector<1x1x1x128xf32>
    %57 = vector.shape_cast %56 : vector<1x1x1x128xf32> to vector<1x128xf32>
    %58 = vector.shape_cast %55 : vector<1x128xf32> to vector<1x1x1x128xf32>
    tpu.vector_store %arg4[%c0_18, %c0_19, %c0_20, %c0_21], %58 {strides = array<i32>} : memref<1x1x1x128xf32, #tpu.memory_space<vmem>>, vector<1x1x1x128xf32>,
    return
  }
  func.func @transform_0(%arg0: i32, %arg1: i32) -> (i32, i32, i32, i32) {
    %c0_i32 = arith.constant 0 : i32
    %c0_i32_0 = arith.constant 0 : i32
    %c0_i32_1 = arith.constant 0 : i32
    return %arg0, %c0_i32, %arg1, %c0_i32_0 : i32, i32, i32, i32
  }
  func.func @transform_1(%arg0: i32, %arg1: i32) -> (i32, i32, i32) {
    %c0_i32 = arith.constant 0 : i32
    %c0_i32_0 = arith.constant 0 : i32
    return %arg0, %arg1, %c0_i32 : i32, i32, i32
  }
  func.func @transform_2(%arg0: i32, %arg1: i32) -> (i32, i32, i32, i32) {
    %c0_i32 = arith.constant 0 : i32
    %c0_i32_0 = arith.constant 0 : i32
    %c0_i32_1 = arith.constant 0 : i32
    return %arg0, %arg1, %c0_i32, %c0_i32_0 : i32, i32, i32, i32
  }
}

</mosaic_0001>

<bundles_post_ra>
// kernel: tpu_custom_call.1
= control target key start
LH: loop header
LB: loop body
LE: loop exit
PB: predicated region body
PF: predicated region fallthrough
CT: control target
= control target key end

     0   :  { %7 = vsyncpa [#allocation3], 0  ;;  %s810_s0 = inlined_call_operand.hbm [shape: f32[2,4,2,128], index: 0, kind: input, shape index: {}]   ;;  %s811_s1 = inlined_call_operand.hbm [shape: s32[2,2,128], index: 1, kind: input, shape index: {}]   ;;  %s812_s2 = inlined_call_operand.hbm [shape: f32[2,1,1,128], index: 2, kind: output, shape index: {}]  }
   0x1   :  { %9 = vsyncpa [#allocation3 + $0x1], 0 }
   0x2   :  { %10 = vsyncpa [#allocation6], 0 }
   0x3   :  { %12 = vsyncpa [#allocation6 + $0x1], 0 }
   0x4   :  { %13 = vsyncpa [#allocation4], 0 }
   0x5   :  { %15 = vsyncpa [#allocation4 + $0x1], 0  ;;  %s662_s9 = smov 0   ;;  %s664_s10 = smov 0  }
   0x6   :  { %s666_s11 = smov 0   ;;  %s668_s12 = smov 0  }
   0x7   :  { %s670_s13 = smov 0   ;;  %s672_s14 = smov 0  }
   0x8 LB: > { %s399_s15 = sadd.s32 4294967295, %s642_s14   ;;  %s400_s16 = sadd.s32 4294967294, %s642_s14   ;;  %s642_s14 = sphi %s672_s14, %s21_s14   ;;  %s638_s13 = sphi %s670_s13, %s822_s13   ;;  %s634_s12 = sphi %s668_s12, %s821_s12   ;;  %s630_s11 = sphi %s666_s11, %s820_s11   ;;  %s626_s10 = sphi %s664_s10, %s819_s10   ;;  %s622_s9 = sphi %s662_s9, %s818_s9  }
   0x9   : > { %s33_s17 = sadd.s32 1, %s638_s13  ;;  %s42_s18 = sadd.s32 1, %s630_s11 }
   0xa   : > { %p35_p0 = scmp.ge.s32.totalorder %s33_s17, 2  ;;  %p49_p1 = scmp.ne.s32.totalorder %s630_s11, %s626_s10 }
   0xb   : > { %p50_p2 = scmp.eq.s32.totalorder %s642_s14, 0  ;;  %p55_p3 = scmp.ne.s32.totalorder %s626_s10, %s622_s9 }
   0xc   : > { %s824_s17 = smov (%p35_p0, %s33_s17), 0  ;;  %p56_p5 = scmp.eq.s32.totalorder %s399_s15, 0 }
   0xd   : > { %p703_p4 = por %p50_p2, %p49_p1  ;;  %s37_s20 = ssub.s32 %s638_s13, %s824_s17 }
   0xe   : > { %p109_p6 = scmp.eq.s32.totalorder %s399_s15, 1  ;;  %p40_p7 = scmp.eq.s32.totalorder %s37_s20, 0 }
   0xf   : > { %p709_p8 = por %p56_p5, %p55_p3  ;;  %p115_p10 = scmp.eq.s32.totalorder %s400_s16, 1 }
  0x10   : > { %p713_p9 = por %p109_p6, %p49_p1  ;;  %p402_p12 = scmp.ge.s32.totalorder %s642_s14, 2 }
  0x11   : > { %s718_s23 = scalar_select %p40_p7, %s630_s11, %s42_s18  }
  0x12   : > { %p720_p11 = por %p115_p10, %p55_p3  ;;  %p431_p13 = scmp.lt.s32.totalorder %s642_s14, 2 }
  0x13   : > { %s135_s25 = sand.u32 1, %s630_s11   ;;  %s413_s27 = sshll.u32 %s638_s13, 3 }
  0x14   : > { %s403_s26 = sshll.u32 %s135_s25, 3  ;;  %s145_s30 = scalar_lea.hbm %s810_s0, %s413_s27 }
  0x15   : > { %s139_s3 = scalar_lea.vmem [#allocation2], %s403_s26  ;;  %s146_s5 = sshll.u32 %s145_s30, 4  ;;  %s147_s5 = int_to_ptr.hbm [resolvable:$true] %s146_s5 }
  0x16   : > { %s148_s4 = sshll.u32 %s139_s3, 4  ;;  %p733_p0 = pnand %p431_p13, %p703_p4  ;;  %s149_s4 = int_to_ptr.vmem [resolvable:$true] %s148_s4 }
  0x17   : > { %p408_p1 = scmp.ge.s32.totalorder %s642_s14, 1  ;;  %s136_s7 = scalar_lea.sflag [#allocation3], %s135_s25 }
  0x18   : > { %s644_s8 = smov 32   ;;  %s645_s15 = smov 2  }
  0x19   : > { %423 = dma.hbm_to_vmem [thread:$0]  (!%p733_p0), %s147_s5, 128, %s149_s4, %s136_s7, %s644_s8, %s644_s8, %s645_s15  }
  0x1a   : > { %p176_p2 = scmp.lt.s32.totalorder %s642_s14, 3  ;;  %s406_s16 = sshll.u32 %s135_s25, 1 }
  0x1b   : > { %s407_s18 = sshll.u32 %s638_s13, 1  ;;  %s162_s27 = scalar_lea.vmem [#allocation5], %s406_s16 }
  0x1c   : > { %p177_p3 = pnand %p408_p1, %p176_p2  ;;  %s167_s19 = scalar_lea.hbm %s811_s1, %s407_s18 }
  0x1d   : > { %s171_s28 = sshll.u32 %s162_s27, 4  ;;  %s169_s29 = sshll.u32 %s167_s19, 4  ;;  %s172_s28 = int_to_ptr.vmem [resolvable:$true] %s171_s28  ;;  %s170_s29 = int_to_ptr.hbm [resolvable:$true] %s169_s29 }
  0x1e   : > { %s159_s30 = scalar_lea.sflag [#allocation6], %s135_s25  ;;  %180 = sbr.rel (%p177_p3) target bundleno = 103 (0x67), region = 28 }
  0x1f   : > { %426 = dma.hbm_to_vmem [thread:$0]  (!%p733_p0), %s170_s29, 32, %s172_s28, %s159_s30  }
  0x20   : > { %s748_s3 = sand.u32 (!%p177_p3), 1, %s626_s10  }
  0x21   : > { %s409_s4 = sshll.u32 (!%p177_p3), %s748_s3, 3  ;;  %s183_s5 = scalar_lea.sflag (!%p177_p3), [#allocation3], %s748_s3 }
  0x22   : > { %s186_s7 = scalar_lea.vmem (!%p177_p3), [#allocation2], %s409_s4 }
  0x23   : > { %609 = dma.done.wait (%p709_p8), %s183_s5, 128  }
  0x24   : > { %611 = vsyncadd (%p709_p8), %s183_s5, 4294967168  ;;  %s410_s25 = sshll.u32 %s748_s3, 1  ;;  %s193_s6 = scalar_lea.sflag [#allocation6], %s748_s3 }
  0x25   : > { %s196_s8 = scalar_lea.vmem [#allocation5], %s410_s25 }
  0x26   : > { %613 = dma.done.wait (%p709_p8), %s193_s6, 32  }
  0x27   : > { %615 = vsyncadd (%p709_p8), %s193_s6, 4294967264  ;;  %vm227_vm0 = vcmask 1041408   ;;  %v222_v0 = vld [vmem:[%s186_s7] sm:$0x3]  ;;  %v223_v1 = vld [vmem:[%s186_s7 + $0x2] sm:$0x3]  ;;  %s294_s16 = scalar_lea.hbm %s812_s2, %s634_s12 }
  0x28   : > { %v224_v2 = vld [vmem:[%s186_s7 + $0x4] sm:$0x3]  ;;  %v225_v3 = vld [vmem:[%s186_s7 + $0x6] sm:$0x3]  ;;  %v228_v4 = vsel %vm227_vm0, %v222_v0, -inf  ;;  %v229_v5 = vsel %vm227_vm0, %v223_v1, -inf }
  0x29   : > { %v230_v6 = vsel %vm227_vm0, %v224_v2, -inf  ;;  %v231_v7 = vsel %vm227_vm0, %v225_v3, -inf  ;;  %v232_v8 = vmax.f32 %v228_v4, %v229_v5  ;;  %v226_v19 = vld [vmem:[%s196_s8] sm:$0x3]  ;;  %v646_v33 = vmov 0.0   ;;  %s221_s18 = scalar_lea.vmem [#allocation7], %s748_s3 }
  0x2a   : > { %v233_v9 = vmax.f32 %v230_v6, %v231_v7  ;;  %vm254_vm1 = vcmp.eq.s32.totalorder %v226_v19, 0  ;;  %vm257_vm2 = vcmp.eq.s32.totalorder %v226_v19, 1  ;;  %vm260_vm3 = vcmp.eq.s32.totalorder %v226_v19, 2  ;;  %s296_s20 = sshll.u32 %s221_s18, 4  ;;  %s298_s26 = sshll.u32 %s294_s16, 4  ;;  %s297_s20 = int_to_ptr.vmem [resolvable:$true] %s296_s20  ;;  %s299_s26 = int_to_ptr.hbm [resolvable:$true] %s298_s26 }
  0x2b   : > { %v256_v34 = vsel %vm254_vm1, 0.25, %v646_v33  ;;  %vm263_vm4 = vcmp.eq.s32.totalorder %v226_v19, 3  ;;  %s285_s19 = scalar_lea.sflag [#allocation4], %s748_s3  ;;  %s570_s27 = sshra.s32 %s299_s26, 4  ;;  %s571_s27 = int_to_ptr.hbm [resolvable:$true] %s570_s27 }
  0x2c   : > { %v234_v10 = vmax.f32 %v232_v8, %v233_v9  ;;  %v259_v36 = vsel %vm257_vm2, 0.25, %v256_v34  ;;  %s572_s28 = scalar_lea.hbm %s571_s27, 1  ;;  %s576_s12 = scalar_lea.hbm %s812_s2, 2 }
  0x2d   : > { %v262_v39 = vsel %vm260_vm3, 0.25, %v259_v36  ;;  %p573_p4 = scmp.ne.s32.totalorder %s571_s27, %s572_s28  ;;  %p577_p7 = scmp.lt.s32.totalorder %s571_s27, %s812_s2 }
  0x2e   : > { %v235_v11 = vsub.f32 %v222_v0, %v234_v10  ;;  %v236_v12 = vsub.f32 %v223_v1, %v234_v10  ;;  %v237_v13 = vsub.f32 %v224_v2, %v234_v10  ;;  %v238_v14 = vsub.f32 %v225_v3, %v234_v10  ;;  %p578_p8 = scmp.lt.s32.totalorder %s576_s12, %s572_s28 }
  0x2f   : > { %v265_v41 = vsel %vm263_vm4, 0.25, %v262_v39  ;;  %p574_p5 = pnand %p573_p4, %p713_p9 }
  0x30   : > { %v239_v15 = vmul.f32 1.442695, %v235_v11  ;;  %v241_v16 = vmul.f32 1.442695, %v236_v12  ;;  %v243_v17 = vmul.f32 1.442695, %v237_v13  ;;  %p579_p10 = por %p578_p8, %p577_p7 }
  0x31   : > { %v245_v18 = vmul.f32 1.442695, %v238_v14  ;;  %v271_v44 = vsub.f32 0.0, %v265_v41  ;;  %p575_p6 = pneg %p574_p5 }
  0x32   : > { %484 = vpow2.f32 %v239_v15 }
  0x33   : > { %486 = vpow2.f32 %v241_v16  ;;  %p580_p13 = pnand %p579_p10, %p575_p6 }
  0x34   : > { %488 = vpow2.f32 %v243_v17 }
  0x35   : > { %490 = vpow2.f32 %v245_v18 }
  0x38   : > { %v485_v20 = vpop.eup %484 }
  0x39   : > { %v487_v21 = vpop.eup %486  ;;  %v247_v22 = vsel %vm227_vm0, %v485_v20, 0.0  ;;  %v255_v29 = vsel %vm254_vm1, %v485_v20, 0.0 }
  0x3a   : > { %v489_v23 = vpop.eup %488  ;;  %v248_v24 = vsel %vm227_vm0, %v487_v21, 0.0  ;;  %v258_v32 = vsel %vm257_vm2, %v487_v21, %v255_v29 }
  0x3b   : > { %v491_v25 = vpop.eup %490  ;;  %v249_v26 = vadd.f32 %v248_v24, %v247_v22  ;;  %v250_v27 = vsel %vm227_vm0, %v489_v23, 0.0  ;;  %v261_v35 = vsel %vm260_vm3, %v489_v23, %v258_v32 }
  0x3c   : > { %v252_v28 = vsel %vm227_vm0, %v491_v25, 0.0  ;;  %v264_v37 = vsel %vm263_vm4, %v491_v25, %v261_v35 }
  0x3d   : > { %v251_v30 = vadd.f32 %v250_v27, %v249_v26 }
  0x3f   : > { %v253_v31 = vadd.f32 %v252_v28, %v251_v30 }
  0x41   : > { %492 = vrcp.f32 %v253_v31 }
  0x47   : > { %v493_v38 = vpop.eup %492 }
  0x48   : > { %v267_v40 = vmul.f32 %v493_v38, %v264_v37 }
  0x4a   : > { %v268_v42 = vadd.f32 0.0001, %v267_v40 }
  0x4c   : > { %v269_v43 = vsub.f32 1.0, %v268_v42  ;;  %494 = vlog2.f32 %v268_v42 }
  0x4e   : > { %v270_v45 = vmul.f32 %v269_v43, %v269_v43 }
  0x50   : > { %v272_v46 = vmul.f32 %v271_v44, %v270_v45 }
  0x52   : > { %v495_v47 = vpop.eup %494 }
  0x53   : > { %v274_v48 = vmul.f32 0.6931472, %v495_v47 }
  0x55   : > { %v275_v49 = vmul.f32 %v274_v48, %v272_v46 }
  0x57   : > { %v276_v50 = vsel %vm227_vm0, %v275_v49, 0.0 }
  0x58   : > { %v277_v51 = vrot.slane %v276_v50, 4 }
  0x5a   : > { %v278_v52 = vadd.f32 %v277_v51, %v276_v50 }
  0x5c   : > { %v279_v53 = vrot.slane %v278_v52, 2 }
  0x5e   : > { %v280_v54 = vadd.f32 %v279_v53, %v278_v52 }
  0x60   : > { %v281_v55 = vrot.slane %v280_v54, 1 }
  0x62   : > { %v282_v56 = vadd.f32 %v281_v55, %v280_v54 }
  0x64   : > { %283 = vst [vmem:[%s221_s18] sm:$0x1] %v282_v56 }
  0x65   : > { %583 = shalt.err (!%p580_p13)
}
  0x66   : > { %418 = dma.vmem_to_hbm [thread:$0]  (%p713_p9), %s297_s20, 16, %s299_s26, %s285_s19  }
  0x67 PF: > { %s310_s3 = sand.u32 1, %s622_s9   ;;  %p428_p0 = pnand %p402_p12, %p720_p11 }
  0x68   : > { %s311_s7 = scalar_lea.sflag [#allocation4], %s310_s3 }
  0x69   : > { %p429_p1 = pneg %p428_p0 }
  0x6b   : > { %617 = dma.done.wait (%p429_p1), %s311_s7, 16  }
  0x6c   : > { %619 = vsyncadd (%p429_p1), %s311_s7, 4294967280  ;;  %s21_s14 = sadd.s32 1, %s642_s14   ;;  %s818_s9 = smov %s626_s10 }
  0x6d   : > { %p18_p2 = scmp.ge.s32.totalorder %s21_s14, 4   ;;  %s819_s10 = smov %s630_s11 }
  0x6e   : > { %s820_s11 = smov %s718_s23  ;;  %s821_s12 = smov %s638_s13 }
  0x6f   : > { %s822_s13 = smov %s824_s17  ;;  %20 = sbr.rel (!%p18_p2) target bundleno = 8 (0x8), region = 86 }
  0x74   :  { %316 = vsyncpa [#allocation3], 1 }
  0x75   :  { %318 = vsyncpa [#allocation3 + $0x1], 1 }
  0x76   :  { %319 = vsyncpa [#allocation6], 1 }
  0x77   :  { %321 = vsyncpa [#allocation6 + $0x1], 1 }
  0x78   :  { %322 = vsyncpa [#allocation4], 1 }
  0x79   :  { %324 = vsyncpa [#allocation4 + $0x1], 1 }

</bundles_post_ra>
